<compile_context>
chip_gen: v7x
topology: tpu7x:2x2x1
jax: 0.10.0
libtpu: 0.0.40
codegen_flags: <defaults>
</compile_context>

<pallas_src>
import jax
import jax.numpy as jnp
from jax.experimental import pallas as pl
from jax.experimental.pallas import tpu as pltpu

KH = KW = 3  # Conv2d kernel size


def _make_conv_tanh_kernel(N, Cin, Cout, W, HW):
    """Build the kernel with all shape parameters baked in statically."""
    NC = N * Cout

    def kernel(x_ref, w_ref, b_ref, o_ref):
        # x_ref: (N*Cin, HW)            f32 VMEM, row n*Cin+ic = spatial of (n, ic)
        # w_ref: (Cin*KH*KW, N*Cout, 1) f32 VMEM, per-tap sublane weight columns
        # b_ref: (N*Cout, 1)            f32 VMEM
        # o_ref: (N*Cout, HW)           f32 VMEM, row n*Cout+oc (wrapper reshapes)
        acc = jnp.zeros((NC, HW), dtype=jnp.float32)

        # Sublane index, used to stitch per-batch replicas into one (NC, HW) slab.
        row_id = None
        if N > 1:
            row_id = jax.lax.broadcasted_iota(jnp.int32, (NC, HW), 0)

        for ic in range(Cin):
            # Replicate channel ic of each batch element across its Cout sublanes:
            # rows [n*Cout, (n+1)*Cout) all hold x[n, ic, :].
            xr = jnp.broadcast_to(x_ref[pl.ds(0 * Cin + ic, 1), :], (NC, HW))
            for n in range(1, N):
                xn = jnp.broadcast_to(x_ref[pl.ds(n * Cin + ic, 1), :], (NC, HW))
                xr = jnp.where(row_id >= n * Cout, xn, xr)

            for kh in range(KH):
                for kw in range(KW):
                    off = kh * W + kw            # flat spatial shift of this tap
                    # XLU lane rotation; wrap-around only hits flat positions the
                    # wrapper's :OH,:OW slice discards (asserted in the wrapper).
                    xs = xr if off == 0 else pltpu.roll(xr, shift=HW - off, axis=1)
                    tap = (ic * KH + kh) * KW + kw
                    acc = acc + w_ref[tap] * xs  # (NC,1) * (NC,HW) broadcast FMA

        # Bias + double tanh (EUP) once over the full slab; single unmasked store.
        o_ref[...] = jnp.tanh(jnp.tanh(acc + b_ref[...])).astype(o_ref.dtype)

    return kernel


@jax.jit
def model_tanh_forward(x_nchw, w_oihw, b):
    """Pallas implementation of ModelTanh.forward.

    x_nchw: (N, Cin, H, W) float32
    w_oihw: (Cout, Cin, KH, KW) float32  (PyTorch Conv2d weight layout)
    b:      (Cout,) float32
    returns (N, Cout, OH, OW) float32
    """
    N, Cin, H, W = x_nchw.shape
    Cout = w_oihw.shape[0]
    OH, OW = H - KH + 1, W - KW + 1
    HW = H * W
    NC = N * Cout

    # Roll-wrap safety: every tap offset read from a *kept* output position must
    # stay inside the flat [0, HW) row-major slab, so wrapped reads only land on
    # positions the :OH,:OW slice discards.  Holds for any stride-1 VALID conv;
    # revisit if padding/stride/dilation ever change.
    max_off = (KH - 1) * W + (KW - 1)
    assert (OH - 1) * W + (OW - 1) + max_off <= HW - 1, "roll wrap would hit valid outputs"

    # Free reshapes only — no pad, no transpose of the activation slab.
    x_slab = x_nchw.reshape(N * Cin, HW)

    # Per-tap weight columns: w_cols[tap, n*Cout+oc, 0] = w[oc, ic, kh, kw],
    # with tap = (ic*KH + kh)*KW + kw.  (Tiny: Cout*Cin*KH*KW floats.)
    w_cols = jnp.tile(
        jnp.transpose(w_oihw, (1, 2, 3, 0)).reshape(Cin * KH * KW, Cout),
        (1, N),
    ).reshape(Cin * KH * KW, NC, 1)
    b_col = jnp.tile(b, N).reshape(NC, 1)

    out_slab = pl.pallas_call(
        _make_conv_tanh_kernel(N, Cin, Cout, W, HW),
        out_shape=jax.ShapeDtypeStruct((NC, HW), x_nchw.dtype),
        in_specs=[
            pl.BlockSpec(memory_space=pltpu.MemorySpace.VMEM),  # x slab (N*Cin, HW)
            pl.BlockSpec(memory_space=pltpu.MemorySpace.VMEM),  # per-tap weight columns
            pl.BlockSpec(memory_space=pltpu.MemorySpace.VMEM),  # bias column
        ],
        out_specs=pl.BlockSpec(memory_space=pltpu.MemorySpace.VMEM),
    )(x_slab, w_cols, b_col)

    # Lane-dense (N*Cout, HW) slab -> NCHW valid window (free reshape + small slice).
    return out_slab.reshape(N, Cout, H, W)[:, :, :OH, :OW]


def _reference(x_nchw, w_oihw, b):
    # Pure-JAX reference for correctness check (HIGHEST precision so the TPU
    # conv doesn't silently drop to bf16 passes).
    y = jax.lax.conv_general_dilated(
        x_nchw, w_oihw, window_strides=(1, 1), padding="VALID",
        dimension_numbers=("NCHW", "OIHW", "NCHW"),
        precision=jax.lax.Precision.HIGHEST)
    y = y + b.reshape(1, -1, 1, 1)
    return jnp.tanh(jnp.tanh(y))


if __name__ == "__main__":
    key = jax.random.PRNGKey(0)
    kx, kw, kb = jax.random.split(key, 3)

    # Small shapes consistent with the module: N=2, Cin=Cout=4, spatial=16.
    N, Cin, Cout, H, W = 2, 4, 4, 16, 16
    x = jax.random.normal(kx, (N, Cin, H, W), dtype=jnp.float32)

    # Deterministic Conv2d-style init: uniform(-1/sqrt(fan_in), 1/sqrt(fan_in)).
    fan_in = Cin * KH * KW
    bound = 1.0 / (fan_in ** 0.5)
    w = jax.random.uniform(kw, (Cout, Cin, KH, KW), jnp.float32, -bound, bound)
    b = jax.random.uniform(kb, (Cout,), jnp.float32, -bound, bound)

    out = model_tanh_forward(x, w, b)
    out = jax.block_until_ready(out)

    ref = jax.block_until_ready(_reference(x, w, b))
    assert out.shape == (N, Cout, H - 2, W - 2), out.shape
    assert jnp.allclose(out, ref, atol=1e-4, rtol=1e-4), (
        float(jnp.max(jnp.abs(out - ref))))

    print("KERNEL_OK")
</pallas_src>

<mosaic_0001>
module attributes {stable_mosaic.version = 11 : i64} {
  func.func @kernel(%arg0: memref<8x256xf32, #tpu.memory_space<vmem>>, %arg1: memref<36x8x1xf32, #tpu.memory_space<vmem>>, %arg2: memref<8x1xf32, #tpu.memory_space<vmem>>, %arg3: memref<8x256xf32, #tpu.memory_space<vmem>>) attributes {dimension_semantics = [], scalar_prefetch = 0 : i64, scratch_operands = 0 : i64, tpu.core_type = #tpu.core_type<tc>} {
    %cst = arith.constant 0.000000e+00 : f32
    %0 = vector.broadcast %cst : f32 to vector<8x256xf32>
    %1 = tpu.iota {dimensions = array<i32: 0>} : vector<8x256xi32>
    %c0 = arith.constant 0 : index
    %c0_0 = arith.constant 0 : index
    %2 = vector.load %arg0[%c0, %c0_0] : memref<8x256xf32, #tpu.memory_space<vmem>>, vector<1x256xf32>
    %3 = vector.shape_cast %2 : vector<1x256xf32> to vector<1x256xf32>
    %4 = vector.broadcast %3 : vector<1x256xf32> to vector<8x256xf32>
    %c4 = arith.constant 4 : index
    %c0_1 = arith.constant 0 : index
    %5 = vector.load %arg0[%c4, %c0_1] : memref<8x256xf32, #tpu.memory_space<vmem>>, vector<1x256xf32>
    %6 = vector.shape_cast %5 : vector<1x256xf32> to vector<1x256xf32>
    %7 = vector.broadcast %6 : vector<1x256xf32> to vector<8x256xf32>
    %c4_i32 = arith.constant 4 : i32
    %8 = vector.broadcast %c4_i32 : i32 to vector<8x256xi32>
    %9 = arith.cmpi sge, %1, %8 : vector<8x256xi32>
    %10 = arith.select %9, %7, %4 : vector<8x256xi1>, vector<8x256xf32>
    %c0_2 = arith.constant 0 : index
    %c0_3 = arith.constant 0 : index
    %c0_4 = arith.constant 0 : index
    %11 = vector.load %arg1[%c0_2, %c0_3, %c0_4] : memref<36x8x1xf32, #tpu.memory_space<vmem>>, vector<1x8x1xf32>
    %12 = vector.shape_cast %11 : vector<1x8x1xf32> to vector<8x1xf32>
    %13 = vector.broadcast %12 : vector<8x1xf32> to vector<8x256xf32>
    %14 = arith.mulf %13, %10 : vector<8x256xf32>
    %15 = arith.addf %0, %14 : vector<8x256xf32>
    %c255_i32 = arith.constant 255 : i32
    %16 = tpu.dynamic_rotate %10 by %c255_i32 dim 1 : vector<8x256xf32>, i32 -> vector<8x256xf32>
    %c1 = arith.constant 1 : index
    %c0_5 = arith.constant 0 : index
    %c0_6 = arith.constant 0 : index
    %17 = vector.load %arg1[%c1, %c0_5, %c0_6] : memref<36x8x1xf32, #tpu.memory_space<vmem>>, vector<1x8x1xf32>
    %18 = vector.shape_cast %17 : vector<1x8x1xf32> to vector<8x1xf32>
    %19 = vector.broadcast %18 : vector<8x1xf32> to vector<8x256xf32>
    %20 = arith.mulf %19, %16 : vector<8x256xf32>
    %21 = arith.addf %15, %20 : vector<8x256xf32>
    %c254_i32 = arith.constant 254 : i32
    %22 = tpu.dynamic_rotate %10 by %c254_i32 dim 1 : vector<8x256xf32>, i32 -> vector<8x256xf32>
    %c2 = arith.constant 2 : index
    %c0_7 = arith.constant 0 : index
    %c0_8 = arith.constant 0 : index
    %23 = vector.load %arg1[%c2, %c0_7, %c0_8] : memref<36x8x1xf32, #tpu.memory_space<vmem>>, vector<1x8x1xf32>
    %24 = vector.shape_cast %23 : vector<1x8x1xf32> to vector<8x1xf32>
    %25 = vector.broadcast %24 : vector<8x1xf32> to vector<8x256xf32>
    %26 = arith.mulf %25, %22 : vector<8x256xf32>
    %27 = arith.addf %21, %26 : vector<8x256xf32>
    %c240_i32 = arith.constant 240 : i32
    %28 = tpu.dynamic_rotate %10 by %c240_i32 dim 1 : vector<8x256xf32>, i32 -> vector<8x256xf32>
    %c3 = arith.constant 3 : index
    %c0_9 = arith.constant 0 : index
    %c0_10 = arith.constant 0 : index
    %29 = vector.load %arg1[%c3, %c0_9, %c0_10] : memref<36x8x1xf32, #tpu.memory_space<vmem>>, vector<1x8x1xf32>
    %30 = vector.shape_cast %29 : vector<1x8x1xf32> to vector<8x1xf32>
    %31 = vector.broadcast %30 : vector<8x1xf32> to vector<8x256xf32>
    %32 = arith.mulf %31, %28 : vector<8x256xf32>
    %33 = arith.addf %27, %32 : vector<8x256xf32>
    %c239_i32 = arith.constant 239 : i32
    %34 = tpu.dynamic_rotate %10 by %c239_i32 dim 1 : vector<8x256xf32>, i32 -> vector<8x256xf32>
    %c4_11 = arith.constant 4 : index
    %c0_12 = arith.constant 0 : index
    %c0_13 = arith.constant 0 : index
    %35 = vector.load %arg1[%c4_11, %c0_12, %c0_13] : memref<36x8x1xf32, #tpu.memory_space<vmem>>, vector<1x8x1xf32>
    %36 = vector.shape_cast %35 : vector<1x8x1xf32> to vector<8x1xf32>
    %37 = vector.broadcast %36 : vector<8x1xf32> to vector<8x256xf32>
    %38 = arith.mulf %37, %34 : vector<8x256xf32>
    %39 = arith.addf %33, %38 : vector<8x256xf32>
    %c238_i32 = arith.constant 238 : i32
    %40 = tpu.dynamic_rotate %10 by %c238_i32 dim 1 : vector<8x256xf32>, i32 -> vector<8x256xf32>
    %c5 = arith.constant 5 : index
    %c0_14 = arith.constant 0 : index
    %c0_15 = arith.constant 0 : index
    %41 = vector.load %arg1[%c5, %c0_14, %c0_15] : memref<36x8x1xf32, #tpu.memory_space<vmem>>, vector<1x8x1xf32>
    %42 = vector.shape_cast %41 : vector<1x8x1xf32> to vector<8x1xf32>
    %43 = vector.broadcast %42 : vector<8x1xf32> to vector<8x256xf32>
    %44 = arith.mulf %43, %40 : vector<8x256xf32>
    %45 = arith.addf %39, %44 : vector<8x256xf32>
    %c224_i32 = arith.constant 224 : i32
    %46 = tpu.dynamic_rotate %10 by %c224_i32 dim 1 : vector<8x256xf32>, i32 -> vector<8x256xf32>
    %c6 = arith.constant 6 : index
    %c0_16 = arith.constant 0 : index
    %c0_17 = arith.constant 0 : index
    %47 = vector.load %arg1[%c6, %c0_16, %c0_17] : memref<36x8x1xf32, #tpu.memory_space<vmem>>, vector<1x8x1xf32>
    %48 = vector.shape_cast %47 : vector<1x8x1xf32> to vector<8x1xf32>
    %49 = vector.broadcast %48 : vector<8x1xf32> to vector<8x256xf32>
    %50 = arith.mulf %49, %46 : vector<8x256xf32>
    %51 = arith.addf %45, %50 : vector<8x256xf32>
    %c223_i32 = arith.constant 223 : i32
    %52 = tpu.dynamic_rotate %10 by %c223_i32 dim 1 : vector<8x256xf32>, i32 -> vector<8x256xf32>
    %c7 = arith.constant 7 : index
    %c0_18 = arith.constant 0 : index
    %c0_19 = arith.constant 0 : index
    %53 = vector.load %arg1[%c7, %c0_18, %c0_19] : memref<36x8x1xf32, #tpu.memory_space<vmem>>, vector<1x8x1xf32>
    %54 = vector.shape_cast %53 : vector<1x8x1xf32> to vector<8x1xf32>
    %55 = vector.broadcast %54 : vector<8x1xf32> to vector<8x256xf32>
    %56 = arith.mulf %55, %52 : vector<8x256xf32>
    %57 = arith.addf %51, %56 : vector<8x256xf32>
    %c222_i32 = arith.constant 222 : i32
    %58 = tpu.dynamic_rotate %10 by %c222_i32 dim 1 : vector<8x256xf32>, i32 -> vector<8x256xf32>
    %c8 = arith.constant 8 : index
    %c0_20 = arith.constant 0 : index
    %c0_21 = arith.constant 0 : index
    %59 = vector.load %arg1[%c8, %c0_20, %c0_21] : memref<36x8x1xf32, #tpu.memory_space<vmem>>, vector<1x8x1xf32>
    %60 = vector.shape_cast %59 : vector<1x8x1xf32> to vector<8x1xf32>
    %61 = vector.broadcast %60 : vector<8x1xf32> to vector<8x256xf32>
    %62 = arith.mulf %61, %58 : vector<8x256xf32>
    %63 = arith.addf %57, %62 : vector<8x256xf32>
    %c1_22 = arith.constant 1 : index
    %c0_23 = arith.constant 0 : index
    %64 = vector.load %arg0[%c1_22, %c0_23] : memref<8x256xf32, #tpu.memory_space<vmem>>, vector<1x256xf32>
    %65 = vector.shape_cast %64 : vector<1x256xf32> to vector<1x256xf32>
    %66 = vector.broadcast %65 : vector<1x256xf32> to vector<8x256xf32>
    %c5_24 = arith.constant 5 : index
    %c0_25 = arith.constant 0 : index
    %67 = vector.load %arg0[%c5_24, %c0_25] : memref<8x256xf32, #tpu.memory_space<vmem>>, vector<1x256xf32>
    %68 = vector.shape_cast %67 : vector<1x256xf32> to vector<1x256xf32>
    %69 = vector.broadcast %68 : vector<1x256xf32> to vector<8x256xf32>
    %c4_i32_26 = arith.constant 4 : i32
    %70 = vector.broadcast %c4_i32_26 : i32 to vector<8x256xi32>
    %71 = arith.cmpi sge, %1, %70 : vector<8x256xi32>
    %72 = arith.select %71, %69, %66 : vector<8x256xi1>, vector<8x256xf32>
    %c9 = arith.constant 9 : index
    %c0_27 = arith.constant 0 : index
    %c0_28 = arith.constant 0 : index
    %73 = vector.load %arg1[%c9, %c0_27, %c0_28] : memref<36x8x1xf32, #tpu.memory_space<vmem>>, vector<1x8x1xf32>
    %74 = vector.shape_cast %73 : vector<1x8x1xf32> to vector<8x1xf32>
    %75 = vector.broadcast %74 : vector<8x1xf32> to vector<8x256xf32>
    %76 = arith.mulf %75, %72 : vector<8x256xf32>
    %77 = arith.addf %63, %76 : vector<8x256xf32>
    %c255_i32_29 = arith.constant 255 : i32
    %78 = tpu.dynamic_rotate %72 by %c255_i32_29 dim 1 : vector<8x256xf32>, i32 -> vector<8x256xf32>
    %c10 = arith.constant 10 : index
    %c0_30 = arith.constant 0 : index
    %c0_31 = arith.constant 0 : index
    %79 = vector.load %arg1[%c10, %c0_30, %c0_31] : memref<36x8x1xf32, #tpu.memory_space<vmem>>, vector<1x8x1xf32>
    %80 = vector.shape_cast %79 : vector<1x8x1xf32> to vector<8x1xf32>
    %81 = vector.broadcast %80 : vector<8x1xf32> to vector<8x256xf32>
    %82 = arith.mulf %81, %78 : vector<8x256xf32>
    %83 = arith.addf %77, %82 : vector<8x256xf32>
    %c254_i32_32 = arith.constant 254 : i32
    %84 = tpu.dynamic_rotate %72 by %c254_i32_32 dim 1 : vector<8x256xf32>, i32 -> vector<8x256xf32>
    %c11 = arith.constant 11 : index
    %c0_33 = arith.constant 0 : index
    %c0_34 = arith.constant 0 : index
    %85 = vector.load %arg1[%c11, %c0_33, %c0_34] : memref<36x8x1xf32, #tpu.memory_space<vmem>>, vector<1x8x1xf32>
    %86 = vector.shape_cast %85 : vector<1x8x1xf32> to vector<8x1xf32>
    %87 = vector.broadcast %86 : vector<8x1xf32> to vector<8x256xf32>
    %88 = arith.mulf %87, %84 : vector<8x256xf32>
    %89 = arith.addf %83, %88 : vector<8x256xf32>
    %c240_i32_35 = arith.constant 240 : i32
    %90 = tpu.dynamic_rotate %72 by %c240_i32_35 dim 1 : vector<8x256xf32>, i32 -> vector<8x256xf32>
    %c12 = arith.constant 12 : index
    %c0_36 = arith.constant 0 : index
    %c0_37 = arith.constant 0 : index
    %91 = vector.load %arg1[%c12, %c0_36, %c0_37] : memref<36x8x1xf32, #tpu.memory_space<vmem>>, vector<1x8x1xf32>
    %92 = vector.shape_cast %91 : vector<1x8x1xf32> to vector<8x1xf32>
    %93 = vector.broadcast %92 : vector<8x1xf32> to vector<8x256xf32>
    %94 = arith.mulf %93, %90 : vector<8x256xf32>
    %95 = arith.addf %89, %94 : vector<8x256xf32>
    %c239_i32_38 = arith.constant 239 : i32
    %96 = tpu.dynamic_rotate %72 by %c239_i32_38 dim 1 : vector<8x256xf32>, i32 -> vector<8x256xf32>
    %c13 = arith.constant 13 : index
    %c0_39 = arith.constant 0 : index
    %c0_40 = arith.constant 0 : index
    %97 = vector.load %arg1[%c13, %c0_39, %c0_40] : memref<36x8x1xf32, #tpu.memory_space<vmem>>, vector<1x8x1xf32>
    %98 = vector.shape_cast %97 : vector<1x8x1xf32> to vector<8x1xf32>
    %99 = vector.broadcast %98 : vector<8x1xf32> to vector<8x256xf32>
    %100 = arith.mulf %99, %96 : vector<8x256xf32>
    %101 = arith.addf %95, %100 : vector<8x256xf32>
    %c238_i32_41 = arith.constant 238 : i32
    %102 = tpu.dynamic_rotate %72 by %c238_i32_41 dim 1 : vector<8x256xf32>, i32 -> vector<8x256xf32>
    %c14 = arith.constant 14 : index
    %c0_42 = arith.constant 0 : index
    %c0_43 = arith.constant 0 : index
    %103 = vector.load %arg1[%c14, %c0_42, %c0_43] : memref<36x8x1xf32, #tpu.memory_space<vmem>>, vector<1x8x1xf32>
    %104 = vector.shape_cast %103 : vector<1x8x1xf32> to vector<8x1xf32>
    %105 = vector.broadcast %104 : vector<8x1xf32> to vector<8x256xf32>
    %106 = arith.mulf %105, %102 : vector<8x256xf32>
    %107 = arith.addf %101, %106 : vector<8x256xf32>
    %c224_i32_44 = arith.constant 224 : i32
    %108 = tpu.dynamic_rotate %72 by %c224_i32_44 dim 1 : vector<8x256xf32>, i32 -> vector<8x256xf32>
    %c15 = arith.constant 15 : index
    %c0_45 = arith.constant 0 : index
    %c0_46 = arith.constant 0 : index
    %109 = vector.load %arg1[%c15, %c0_45, %c0_46] : memref<36x8x1xf32, #tpu.memory_space<vmem>>, vector<1x8x1xf32>
    %110 = vector.shape_cast %109 : vector<1x8x1xf32> to vector<8x1xf32>
    %111 = vector.broadcast %110 : vector<8x1xf32> to vector<8x256xf32>
    %112 = arith.mulf %111, %108 : vector<8x256xf32>
    %113 = arith.addf %107, %112 : vector<8x256xf32>
    %c223_i32_47 = arith.constant 223 : i32
    %114 = tpu.dynamic_rotate %72 by %c223_i32_47 dim 1 : vector<8x256xf32>, i32 -> vector<8x256xf32>
    %c16 = arith.constant 16 : index
    %c0_48 = arith.constant 0 : index
    %c0_49 = arith.constant 0 : index
    %115 = vector.load %arg1[%c16, %c0_48, %c0_49] : memref<36x8x1xf32, #tpu.memory_space<vmem>>, vector<1x8x1xf32>
    %116 = vector.shape_cast %115 : vector<1x8x1xf32> to vector<8x1xf32>
    %117 = vector.broadcast %116 : vector<8x1xf32> to vector<8x256xf32>
    %118 = arith.mulf %117, %114 : vector<8x256xf32>
    %119 = arith.addf %113, %118 : vector<8x256xf32>
    %c222_i32_50 = arith.constant 222 : i32
    %120 = tpu.dynamic_rotate %72 by %c222_i32_50 dim 1 : vector<8x256xf32>, i32 -> vector<8x256xf32>
    %c17 = arith.constant 17 : index
    %c0_51 = arith.constant 0 : index
    %c0_52 = arith.constant 0 : index
    %121 = vector.load %arg1[%c17, %c0_51, %c0_52] : memref<36x8x1xf32, #tpu.memory_space<vmem>>, vector<1x8x1xf32>
    %122 = vector.shape_cast %121 : vector<1x8x1xf32> to vector<8x1xf32>
    %123 = vector.broadcast %122 : vector<8x1xf32> to vector<8x256xf32>
    %124 = arith.mulf %123, %120 : vector<8x256xf32>
    %125 = arith.addf %119, %124 : vector<8x256xf32>
    %c2_53 = arith.constant 2 : index
    %c0_54 = arith.constant 0 : index
    %126 = vector.load %arg0[%c2_53, %c0_54] : memref<8x256xf32, #tpu.memory_space<vmem>>, vector<1x256xf32>
    %127 = vector.shape_cast %126 : vector<1x256xf32> to vector<1x256xf32>
    %128 = vector.broadcast %127 : vector<1x256xf32> to vector<8x256xf32>
    %c6_55 = arith.constant 6 : index
    %c0_56 = arith.constant 0 : index
    %129 = vector.load %arg0[%c6_55, %c0_56] : memref<8x256xf32, #tpu.memory_space<vmem>>, vector<1x256xf32>
    %130 = vector.shape_cast %129 : vector<1x256xf32> to vector<1x256xf32>
    %131 = vector.broadcast %130 : vector<1x256xf32> to vector<8x256xf32>
    %c4_i32_57 = arith.constant 4 : i32
    %132 = vector.broadcast %c4_i32_57 : i32 to vector<8x256xi32>
    %133 = arith.cmpi sge, %1, %132 : vector<8x256xi32>
    %134 = arith.select %133, %131, %128 : vector<8x256xi1>, vector<8x256xf32>
    %c18 = arith.constant 18 : index
    %c0_58 = arith.constant 0 : index
    %c0_59 = arith.constant 0 : index
    %135 = vector.load %arg1[%c18, %c0_58, %c0_59] : memref<36x8x1xf32, #tpu.memory_space<vmem>>, vector<1x8x1xf32>
    %136 = vector.shape_cast %135 : vector<1x8x1xf32> to vector<8x1xf32>
    %137 = vector.broadcast %136 : vector<8x1xf32> to vector<8x256xf32>
    %138 = arith.mulf %137, %134 : vector<8x256xf32>
    %139 = arith.addf %125, %138 : vector<8x256xf32>
    %c255_i32_60 = arith.constant 255 : i32
    %140 = tpu.dynamic_rotate %134 by %c255_i32_60 dim 1 : vector<8x256xf32>, i32 -> vector<8x256xf32>
    %c19 = arith.constant 19 : index
    %c0_61 = arith.constant 0 : index
    %c0_62 = arith.constant 0 : index
    %141 = vector.load %arg1[%c19, %c0_61, %c0_62] : memref<36x8x1xf32, #tpu.memory_space<vmem>>, vector<1x8x1xf32>
    %142 = vector.shape_cast %141 : vector<1x8x1xf32> to vector<8x1xf32>
    %143 = vector.broadcast %142 : vector<8x1xf32> to vector<8x256xf32>
    %144 = arith.mulf %143, %140 : vector<8x256xf32>
    %145 = arith.addf %139, %144 : vector<8x256xf32>
    %c254_i32_63 = arith.constant 254 : i32
    %146 = tpu.dynamic_rotate %134 by %c254_i32_63 dim 1 : vector<8x256xf32>, i32 -> vector<8x256xf32>
    %c20 = arith.constant 20 : index
    %c0_64 = arith.constant 0 : index
    %c0_65 = arith.constant 0 : index
    %147 = vector.load %arg1[%c20, %c0_64, %c0_65] : memref<36x8x1xf32, #tpu.memory_space<vmem>>, vector<1x8x1xf32>
    %148 = vector.shape_cast %147 : vector<1x8x1xf32> to vector<8x1xf32>
    %149 = vector.broadcast %148 : vector<8x1xf32> to vector<8x256xf32>
    %150 = arith.mulf %149, %146 : vector<8x256xf32>
    %151 = arith.addf %145, %150 : vector<8x256xf32>
    %c240_i32_66 = arith.constant 240 : i32
    %152 = tpu.dynamic_rotate %134 by %c240_i32_66 dim 1 : vector<8x256xf32>, i32 -> vector<8x256xf32>
    %c21 = arith.constant 21 : index
    %c0_67 = arith.constant 0 : index
    %c0_68 = arith.constant 0 : index
    %153 = vector.load %arg1[%c21, %c0_67, %c0_68] : memref<36x8x1xf32, #tpu.memory_space<vmem>>, vector<1x8x1xf32>
    %154 = vector.shape_cast %153 : vector<1x8x1xf32> to vector<8x1xf32>
    %155 = vector.broadcast %154 : vector<8x1xf32> to vector<8x256xf32>
    %156 = arith.mulf %155, %152 : vector<8x256xf32>
    %157 = arith.addf %151, %156 : vector<8x256xf32>
    %c239_i32_69 = arith.constant 239 : i32
    %158 = tpu.dynamic_rotate %134 by %c239_i32_69 dim 1 : vector<8x256xf32>, i32 -> vector<8x256xf32>
    %c22 = arith.constant 22 : index
    %c0_70 = arith.constant 0 : index
    %c0_71 = arith.constant 0 : index
    %159 = vector.load %arg1[%c22, %c0_70, %c0_71] : memref<36x8x1xf32, #tpu.memory_space<vmem>>, vector<1x8x1xf32>
    %160 = vector.shape_cast %159 : vector<1x8x1xf32> to vector<8x1xf32>
    %161 = vector.broadcast %160 : vector<8x1xf32> to vector<8x256xf32>
    %162 = arith.mulf %161, %158 : vector<8x256xf32>
    %163 = arith.addf %157, %162 : vector<8x256xf32>
    %c238_i32_72 = arith.constant 238 : i32
    %164 = tpu.dynamic_rotate %134 by %c238_i32_72 dim 1 : vector<8x256xf32>, i32 -> vector<8x256xf32>
    %c23 = arith.constant 23 : index
    %c0_73 = arith.constant 0 : index
    %c0_74 = arith.constant 0 : index
    %165 = vector.load %arg1[%c23, %c0_73, %c0_74] : memref<36x8x1xf32, #tpu.memory_space<vmem>>, vector<1x8x1xf32>
    %166 = vector.shape_cast %165 : vector<1x8x1xf32> to vector<8x1xf32>
    %167 = vector.broadcast %166 : vector<8x1xf32> to vector<8x256xf32>
    %168 = arith.mulf %167, %164 : vector<8x256xf32>
    %169 = arith.addf %163, %168 : vector<8x256xf32>
    %c224_i32_75 = arith.constant 224 : i32
    %170 = tpu.dynamic_rotate %134 by %c224_i32_75 dim 1 : vector<8x256xf32>, i32 -> vector<8x256xf32>
    %c24 = arith.constant 24 : index
    %c0_76 = arith.constant 0 : index
    %c0_77 = arith.constant 0 : index
    %171 = vector.load %arg1[%c24, %c0_76, %c0_77] : memref<36x8x1xf32, #tpu.memory_space<vmem>>, vector<1x8x1xf32>
    %172 = vector.shape_cast %171 : vector<1x8x1xf32> to vector<8x1xf32>
    %173 = vector.broadcast %172 : vector<8x1xf32> to vector<8x256xf32>
    %174 = arith.mulf %173, %170 : vector<8x256xf32>
    %175 = arith.addf %169, %174 : vector<8x256xf32>
    %c223_i32_78 = arith.constant 223 : i32
    %176 = tpu.dynamic_rotate %134 by %c223_i32_78 dim 1 : vector<8x256xf32>, i32 -> vector<8x256xf32>
    %c25 = arith.constant 25 : index
    %c0_79 = arith.constant 0 : index
    %c0_80 = arith.constant 0 : index
    %177 = vector.load %arg1[%c25, %c0_79, %c0_80] : memref<36x8x1xf32, #tpu.memory_space<vmem>>, vector<1x8x1xf32>
    %178 = vector.shape_cast %177 : vector<1x8x1xf32> to vector<8x1xf32>
    %179 = vector.broadcast %178 : vector<8x1xf32> to vector<8x256xf32>
    %180 = arith.mulf %179, %176 : vector<8x256xf32>
    %181 = arith.addf %175, %180 : vector<8x256xf32>
    %c222_i32_81 = arith.constant 222 : i32
    %182 = tpu.dynamic_rotate %134 by %c222_i32_81 dim 1 : vector<8x256xf32>, i32 -> vector<8x256xf32>
    %c26 = arith.constant 26 : index
    %c0_82 = arith.constant 0 : index
    %c0_83 = arith.constant 0 : index
    %183 = vector.load %arg1[%c26, %c0_82, %c0_83] : memref<36x8x1xf32, #tpu.memory_space<vmem>>, vector<1x8x1xf32>
    %184 = vector.shape_cast %183 : vector<1x8x1xf32> to vector<8x1xf32>
    %185 = vector.broadcast %184 : vector<8x1xf32> to vector<8x256xf32>
    %186 = arith.mulf %185, %182 : vector<8x256xf32>
    %187 = arith.addf %181, %186 : vector<8x256xf32>
    %c3_84 = arith.constant 3 : index
    %c0_85 = arith.constant 0 : index
    %188 = vector.load %arg0[%c3_84, %c0_85] : memref<8x256xf32, #tpu.memory_space<vmem>>, vector<1x256xf32>
    %189 = vector.shape_cast %188 : vector<1x256xf32> to vector<1x256xf32>
    %190 = vector.broadcast %189 : vector<1x256xf32> to vector<8x256xf32>
    %c7_86 = arith.constant 7 : index
    %c0_87 = arith.constant 0 : index
    %191 = vector.load %arg0[%c7_86, %c0_87] : memref<8x256xf32, #tpu.memory_space<vmem>>, vector<1x256xf32>
    %192 = vector.shape_cast %191 : vector<1x256xf32> to vector<1x256xf32>
    %193 = vector.broadcast %192 : vector<1x256xf32> to vector<8x256xf32>
    %c4_i32_88 = arith.constant 4 : i32
    %194 = vector.broadcast %c4_i32_88 : i32 to vector<8x256xi32>
    %195 = arith.cmpi sge, %1, %194 : vector<8x256xi32>
    %196 = arith.select %195, %193, %190 : vector<8x256xi1>, vector<8x256xf32>
    %c27 = arith.constant 27 : index
    %c0_89 = arith.constant 0 : index
    %c0_90 = arith.constant 0 : index
    %197 = vector.load %arg1[%c27, %c0_89, %c0_90] : memref<36x8x1xf32, #tpu.memory_space<vmem>>, vector<1x8x1xf32>
    %198 = vector.shape_cast %197 : vector<1x8x1xf32> to vector<8x1xf32>
    %199 = vector.broadcast %198 : vector<8x1xf32> to vector<8x256xf32>
    %200 = arith.mulf %199, %196 : vector<8x256xf32>
    %201 = arith.addf %187, %200 : vector<8x256xf32>
    %c255_i32_91 = arith.constant 255 : i32
    %202 = tpu.dynamic_rotate %196 by %c255_i32_91 dim 1 : vector<8x256xf32>, i32 -> vector<8x256xf32>
    %c28 = arith.constant 28 : index
    %c0_92 = arith.constant 0 : index
    %c0_93 = arith.constant 0 : index
    %203 = vector.load %arg1[%c28, %c0_92, %c0_93] : memref<36x8x1xf32, #tpu.memory_space<vmem>>, vector<1x8x1xf32>
    %204 = vector.shape_cast %203 : vector<1x8x1xf32> to vector<8x1xf32>
    %205 = vector.broadcast %204 : vector<8x1xf32> to vector<8x256xf32>
    %206 = arith.mulf %205, %202 : vector<8x256xf32>
    %207 = arith.addf %201, %206 : vector<8x256xf32>
    %c254_i32_94 = arith.constant 254 : i32
    %208 = tpu.dynamic_rotate %196 by %c254_i32_94 dim 1 : vector<8x256xf32>, i32 -> vector<8x256xf32>
    %c29 = arith.constant 29 : index
    %c0_95 = arith.constant 0 : index
    %c0_96 = arith.constant 0 : index
    %209 = vector.load %arg1[%c29, %c0_95, %c0_96] : memref<36x8x1xf32, #tpu.memory_space<vmem>>, vector<1x8x1xf32>
    %210 = vector.shape_cast %209 : vector<1x8x1xf32> to vector<8x1xf32>
    %211 = vector.broadcast %210 : vector<8x1xf32> to vector<8x256xf32>
    %212 = arith.mulf %211, %208 : vector<8x256xf32>
    %213 = arith.addf %207, %212 : vector<8x256xf32>
    %c240_i32_97 = arith.constant 240 : i32
    %214 = tpu.dynamic_rotate %196 by %c240_i32_97 dim 1 : vector<8x256xf32>, i32 -> vector<8x256xf32>
    %c30 = arith.constant 30 : index
    %c0_98 = arith.constant 0 : index
    %c0_99 = arith.constant 0 : index
    %215 = vector.load %arg1[%c30, %c0_98, %c0_99] : memref<36x8x1xf32, #tpu.memory_space<vmem>>, vector<1x8x1xf32>
    %216 = vector.shape_cast %215 : vector<1x8x1xf32> to vector<8x1xf32>
    %217 = vector.broadcast %216 : vector<8x1xf32> to vector<8x256xf32>
    %218 = arith.mulf %217, %214 : vector<8x256xf32>
    %219 = arith.addf %213, %218 : vector<8x256xf32>
    %c239_i32_100 = arith.constant 239 : i32
    %220 = tpu.dynamic_rotate %196 by %c239_i32_100 dim 1 : vector<8x256xf32>, i32 -> vector<8x256xf32>
    %c31 = arith.constant 31 : index
    %c0_101 = arith.constant 0 : index
    %c0_102 = arith.constant 0 : index
    %221 = vector.load %arg1[%c31, %c0_101, %c0_102] : memref<36x8x1xf32, #tpu.memory_space<vmem>>, vector<1x8x1xf32>
    %222 = vector.shape_cast %221 : vector<1x8x1xf32> to vector<8x1xf32>
    %223 = vector.broadcast %222 : vector<8x1xf32> to vector<8x256xf32>
    %224 = arith.mulf %223, %220 : vector<8x256xf32>
    %225 = arith.addf %219, %224 : vector<8x256xf32>
    %c238_i32_103 = arith.constant 238 : i32
    %226 = tpu.dynamic_rotate %196 by %c238_i32_103 dim 1 : vector<8x256xf32>, i32 -> vector<8x256xf32>
    %c32 = arith.constant 32 : index
    %c0_104 = arith.constant 0 : index
    %c0_105 = arith.constant 0 : index
    %227 = vector.load %arg1[%c32, %c0_104, %c0_105] : memref<36x8x1xf32, #tpu.memory_space<vmem>>, vector<1x8x1xf32>
    %228 = vector.shape_cast %227 : vector<1x8x1xf32> to vector<8x1xf32>
    %229 = vector.broadcast %228 : vector<8x1xf32> to vector<8x256xf32>
    %230 = arith.mulf %229, %226 : vector<8x256xf32>
    %231 = arith.addf %225, %230 : vector<8x256xf32>
    %c224_i32_106 = arith.constant 224 : i32
    %232 = tpu.dynamic_rotate %196 by %c224_i32_106 dim 1 : vector<8x256xf32>, i32 -> vector<8x256xf32>
    %c33 = arith.constant 33 : index
    %c0_107 = arith.constant 0 : index
    %c0_108 = arith.constant 0 : index
    %233 = vector.load %arg1[%c33, %c0_107, %c0_108] : memref<36x8x1xf32, #tpu.memory_space<vmem>>, vector<1x8x1xf32>
    %234 = vector.shape_cast %233 : vector<1x8x1xf32> to vector<8x1xf32>
    %235 = vector.broadcast %234 : vector<8x1xf32> to vector<8x256xf32>
    %236 = arith.mulf %235, %232 : vector<8x256xf32>
    %237 = arith.addf %231, %236 : vector<8x256xf32>
    %c223_i32_109 = arith.constant 223 : i32
    %238 = tpu.dynamic_rotate %196 by %c223_i32_109 dim 1 : vector<8x256xf32>, i32 -> vector<8x256xf32>
    %c34 = arith.constant 34 : index
    %c0_110 = arith.constant 0 : index
    %c0_111 = arith.constant 0 : index
    %239 = vector.load %arg1[%c34, %c0_110, %c0_111] : memref<36x8x1xf32, #tpu.memory_space<vmem>>, vector<1x8x1xf32>
    %240 = vector.shape_cast %239 : vector<1x8x1xf32> to vector<8x1xf32>
    %241 = vector.broadcast %240 : vector<8x1xf32> to vector<8x256xf32>
    %242 = arith.mulf %241, %238 : vector<8x256xf32>
    %243 = arith.addf %237, %242 : vector<8x256xf32>
    %c222_i32_112 = arith.constant 222 : i32
    %244 = tpu.dynamic_rotate %196 by %c222_i32_112 dim 1 : vector<8x256xf32>, i32 -> vector<8x256xf32>
    %c35 = arith.constant 35 : index
    %c0_113 = arith.constant 0 : index
    %c0_114 = arith.constant 0 : index
    %245 = vector.load %arg1[%c35, %c0_113, %c0_114] : memref<36x8x1xf32, #tpu.memory_space<vmem>>, vector<1x8x1xf32>
    %246 = vector.shape_cast %245 : vector<1x8x1xf32> to vector<8x1xf32>
    %247 = vector.broadcast %246 : vector<8x1xf32> to vector<8x256xf32>
    %248 = arith.mulf %247, %244 : vector<8x256xf32>
    %249 = arith.addf %243, %248 : vector<8x256xf32>
    %c0_115 = arith.constant 0 : index
    %c0_116 = arith.constant 0 : index
    %250 = vector.load %arg2[%c0_115, %c0_116] : memref<8x1xf32, #tpu.memory_space<vmem>>, vector<8x1xf32>
    %251 = vector.broadcast %250 : vector<8x1xf32> to vector<8x256xf32>
    %252 = arith.addf %249, %251 : vector<8x256xf32>
    %253 = math.tanh %252 : vector<8x256xf32>
    %254 = math.tanh %253 : vector<8x256xf32>
    %c0_117 = arith.constant 0 : index
    %c0_118 = arith.constant 0 : index
    %255 = vector.load %arg3[%c0_117, %c0_118] : memref<8x256xf32, #tpu.memory_space<vmem>>, vector<8x256xf32>
    tpu.vector_store %arg3[%c0_117, %c0_118], %254 {strides = array<i32>} : memref<8x256xf32, #tpu.memory_space<vmem>>, vector<8x256xf32>,
    return
  }
}

</mosaic_0001>

<bundles_post_ra>
// kernel: tile.16
= control target key start
LH: loop header
LB: loop body
LE: loop exit
PB: predicated region body
PF: predicated region fallthrough
CT: control target
= control target key end

     0   :  { %s22_s0 = inlined_call_operand.vmem [shape: f32[4], index: 0, kind: input, shape index: {}]   ;;  %s23_s1 = inlined_call_operand.vmem [shape: f32[2,4], index: 1, kind: output, shape index: {}]  }
   0x1   :  { %v4_v0 = vld [vmem:[%s22_s0] ss:$0 sm:$0xff] }
   0x2   :  { %5 = vst [vmem:[%s23_s1] sm:$0x3] %v4_v0 }

// kernel: tile.0
= control target key start
LH: loop header
LB: loop body
LE: loop exit
PB: predicated region body
PF: predicated region fallthrough
CT: control target
= control target key end

     0   :  { %s34_s8 = smov 125   ;;  %vm7_vm0 = vcmask 7168   ;;  %s35_s11 = smov 126   ;;  %s61_s0 = inlined_call_operand.vmem [shape: f32[2,4], index: 0, kind: input, shape index: {}]   ;;  %s62_s1 = inlined_call_operand.vmem [shape: f32[8,1], index: 1, kind: output, shape index: {}]  }
   0x1   :  { %v4_v0 = vld [vmem:[%s61_s0] sm:$0x3]  ;;  %s33_s0 = smov 127  }
   0x2   :  { %5 = vst [vmem:[#allocation0] sm:$0x3] %v4_v0 }
   0x9   :  { %v9_v1 = vld [vmem:[#allocation0] sm:$0x3]  }
   0xa   :  { %v21_v2 = vld [vmem:[#allocation0] sm:$0x3]   ;;  %10 = vrot.lane.b32.xlu0 %v9_v1, %s33_s0 }
   0xb   :  { %22 = vrot.lane.b32.xlu1 %v21_v2, %s34_s8  ;;  %v6_v3 = vld [vmem:[#allocation0] sm:$0x3]  }
   0xc   :  { %v15_v4 = vld [vmem:[#allocation0] sm:$0x3]   ;;  %8 = vst.msk [vmem:[%s62_s1] ss:$4 sm:$0x3] %vm7_vm0, %v6_v3  }
   0xe   :  { %16 = vrot.lane.b32.xlu0 %v15_v4, %s35_s11 }
  0x7c   :  { %v11_v5 = vpop.permute.xlu0 %10  }
  0x7d   :  { %v23_v6 = vpop.permute.xlu1 %22   ;;  %27 = vst.msk [vmem:[%s62_s1 + $0x1] ss:$4 sm:$0x3] %vm7_vm0, %v11_v5  }
  0x7e   :  { %29 = vst.msk [vmem:[%s62_s1 + $0x3] ss:$4 sm:$0x3] %vm7_vm0, %v23_v6  }
  0x80   :  { %v17_v7 = vpop.permute.xlu0 %16  }
  0x81   :  { %28 = vst.msk [vmem:[%s62_s1 + $0x2] ss:$4 sm:$0x3] %vm7_vm0, %v17_v7  }

// kernel: model_tanh_forward.1
= control target key start
LH: loop header
LB: loop body
LE: loop exit
PB: predicated region body
PF: predicated region fallthrough
CT: control target
= control target key end

     0   :  { %v14_v0 = vlaneseq  ;;  %v804_v1 = vmov 0   ;;  %s805_s20 = smov 127   ;;  %s806_s25 = smov 126   ;;  %s1307_s1 = inlined_call_operand.vmem [shape: f32[36,8,1], index: 1, kind: input, shape index: {}]   ;;  %s1308_s0 = inlined_call_operand.vmem [shape: f32[8,256], index: 0, kind: input, shape index: {}]   ;;  %s1309_s2 = inlined_call_operand.vmem [shape: f32[8,1], index: 2, kind: input, shape index: {}]   ;;  %s1310_s3 = inlined_call_operand.vmem [shape: f32[8,256], index: 3, kind: output, shape index: {}]  }
   0x1   :  { %795 = vset.pattern.permute.xlu1 %v804_v1  ;;  %794 = vset.pattern.permute.xlu0 %v804_v1  ;;  %v744_v2 = vld [vmem:[%s1307_s1 + $0x8] sm:$0xff]  ;;  %v44_v3 = vld [vmem:[%s1307_s1] sm:$0xff]  ;;  %v745_v23 = vld [vmem:[%s1307_s1 + $0x10] sm:$0xff]  ;;  %s807_s28 = smov 112   ;;  %s808_s4 = smov 111  }
   0x2   :  { %67 = vperm.xlu1 %795, %v744_v2   ;;  %47 = vperm.xlu0 %794, %v44_v3   ;;  %v840_v4 = vshrl.u32 %v14_v0, 7  ;;  %v16_v5 = vld [vmem:[%s1308_s0] ss:$8 sm:$0x3]  ;;  %v746_v24 = vld [vmem:[%s1307_s1 + $0x18] sm:$0xff]  ;;  %s809_s7 = smov 110  }
   0x3   :  { %v743_v6 = vld [vmem:[%s1308_s0 + $0x4] ss:$8 sm:$0x3]  ;;  %v763_v15 = vld [vmem:[%s1308_s0 + $0x2] ss:$8 sm:$0x3] }
   0x4   :  { %v849_v7 = vsub.s32 0, %v840_v4  ;;  %v852_v8 = vsub.s32 1, %v840_v4  ;;  %vm41_vm0 = vcmp.ge.s32.totalorder %v840_v4, 4  ;;  %v764_v16 = vld [vmem:[%s1308_s0 + $0x6] ss:$8 sm:$0x3] }
   0x5   :  { %v747_v25 = vld [vmem:[%s1307_s1 + $0x20] sm:$0xff]  ;;  %v748_v28 = vld [vmem:[%s1307_s1 + $0x28] sm:$0xff]  ;;  %s810_s14 = smov 96   ;;  %v749_v35 = vld [vmem:[%s1307_s1 + $0x30] sm:$0xff]  ;;  %s811_s17 = smov 95   ;;  %v1067_v62 = vand.u32 127, %v14_v0 }
   0x6   :  { %v25_v9 = vrot.slane %v16_v5, %v852_v8  ;;  %v38_v10 = vrot.slane %v743_v6, %v852_v8  ;;  %v21_v11 = vrot.slane %v16_v5, %v849_v7  ;;  %v34_v12 = vrot.slane %v743_v6, %v849_v7  ;;  %v774_v26 = vld [vmem:[%s1308_s0 + $0x3] ss:$8 sm:$0x3]  ;;  %v775_v27 = vld [vmem:[%s1308_s0 + $0x7] ss:$8 sm:$0x3] }
   0x7   :  { %v381_v17 = vrot.slane %v763_v15, %v849_v7  ;;  %v394_v18 = vrot.slane %v764_v16, %v849_v7  ;;  %v385_v19 = vrot.slane %v763_v15, %v852_v8  ;;  %v398_v20 = vrot.slane %v764_v16, %v852_v8  ;;  %v750_v36 = vld [vmem:[%s1307_s1 + $0x38] sm:$0xff]  ;;  %v752_v37 = vld [vmem:[%s1308_s0 + $0x1] ss:$8 sm:$0x3]  ;;  %s812_s26 = smov 94   ;;  %v755_v47 = vld [vmem:[%s1307_s1 + $0x50] sm:$0xff] }
   0x8   :  { %v861_v13 = vsel %vm41_vm0, %v38_v10, %v25_v9  ;;  %v865_v14 = vsel %vm41_vm0, %v34_v12, %v21_v11  ;;  %v556_v29 = vrot.slane %v774_v26, %v849_v7  ;;  %v569_v30 = vrot.slane %v775_v27, %v849_v7  ;;  %v753_v38 = vld [vmem:[%s1308_s0 + $0x5] ss:$8 sm:$0x3]  ;;  %v756_v48 = vld [vmem:[%s1307_s1 + $0x58] sm:$0xff]  ;;  %v759_v51 = vld [vmem:[%s1307_s1 + $0x70] sm:$0xff] }
   0x9   :  { %56 = vrot.lane.b32.xlu1 %v861_v13, %s805_s20  ;;  %54 = vrot.lane.b32.xlu0 %v865_v14, %s805_s20  ;;  %v883_v21 = vsel %vm41_vm0, %v394_v18, %v381_v17  ;;  %v887_v22 = vsel %vm41_vm0, %v398_v20, %v385_v19  ;;  %v560_v32 = vrot.slane %v774_v26, %v852_v8  ;;  %v754_v39 = vld [vmem:[%s1307_s1 + $0x48] sm:$0xff]  ;;  %v751_v40 = vld [vmem:[%s1307_s1 + $0x40] sm:$0xff]  ;;  %vm60_vm1 = vcmp.lt.s32.totalorder %v1067_v62, 127 }
   0xa   :  { %v925_v31 = vsel %vm41_vm0, %v569_v30, %v556_v29  ;;  %v573_v33 = vrot.slane %v775_v27, %v852_v8  ;;  %v210_v41 = vrot.slane %v752_v37, %v852_v8  ;;  %v223_v42 = vrot.slane %v753_v38, %v852_v8  ;;  %v757_v49 = vld [vmem:[%s1307_s1 + $0x60] sm:$0xff]  ;;  %v758_v50 = vld [vmem:[%s1307_s1 + $0x68] sm:$0xff]  ;;  %v760_v52 = vld [vmem:[%s1307_s1 + $0x78] sm:$0xff] }
   0xb   :  { %v206_v43 = vrot.slane %v752_v37, %v849_v7  ;;  %v219_v44 = vrot.slane %v753_v38, %v849_v7  ;;  %v761_v53 = vld [vmem:[%s1307_s1 + $0x80] sm:$0xff]  ;;  %v762_v54 = vld [vmem:[%s1307_s1 + $0x88] sm:$0xff]  ;;  %v765_v55 = vld [vmem:[%s1307_s1 + $0x90] sm:$0xff]  ;;  %vm78_vm2 = vcmp.lt.s32.totalorder %v1067_v62, 126  ;;  %vm96_vm3 = vcmp.lt.s32.totalorder %v1067_v62, 112 }
   0xc   :  { %v933_v34 = vsel %vm41_vm0, %v573_v33, %v560_v32  ;;  %v971_v45 = vsel %vm41_vm0, %v223_v42, %v210_v41  ;;  %v766_v56 = vld [vmem:[%s1307_s1 + $0x98] sm:$0xff]  ;;  %v768_v57 = vld [vmem:[%s1307_s1 + $0xa8] sm:$0xff]  ;;  %v767_v58 = vld [vmem:[%s1307_s1 + $0xa0] sm:$0xff]  ;;  %vm114_vm4 = vcmp.lt.s32.totalorder %v1067_v62, 111  ;;  %vm132_vm5 = vcmp.lt.s32.totalorder %v1067_v62, 110 }
   0xd   :  { %76 = vrot.lane.b32.xlu1 %v861_v13, %s806_s25  ;;  %74 = vrot.lane.b32.xlu0 %v865_v14, %s806_s25  ;;  %v975_v46 = vsel %vm41_vm0, %v219_v44, %v206_v43  ;;  %v770_v59 = vld [vmem:[%s1307_s1 + $0xb8] sm:$0xff]  ;;  %v769_v60 = vld [vmem:[%s1307_s1 + $0xb0] sm:$0xff]  ;;  %vm150_vm6 = vcmp.lt.s32.totalorder %v1067_v62, 96  ;;  %vm168_vm7 = vcmp.lt.s32.totalorder %v1067_v62, 95  ;;  %vm186_vm8 = vcmp.lt.s32.totalorder %v1067_v62, 94 }
   0xe   :  { %v771_v61 = vld [vmem:[%s1307_s1 + $0xc0] sm:$0xff]  ;;  %v772_v2 = vld [vmem:[%s1307_s1 + $0xc8] sm:$0xff]  ;;  %v773_v10 = vld [vmem:[%s1307_s1 + $0xd0] sm:$0xff] }
   0xf   :  { %v776_v16 = vld [vmem:[%s1307_s1 + $0xd8] sm:$0xff]  ;;  %v777_v33 = vld [vmem:[%s1307_s1 + $0xe0] sm:$0xff]  ;;  %v778_v41 = vld [vmem:[%s1307_s1 + $0xe8] sm:$0xff] }
  0x11   :  { %92 = vrot.lane.b32.xlu1 %v865_v14, %s807_s28  ;;  %85 = vperm.xlu0 %794, %v745_v23  }
  0x15   :  { %103 = vperm.xlu1 %795, %v746_v24   ;;  %94 = vrot.lane.b32.xlu0 %v861_v13, %s807_s28 }
  0x19   :  { %112 = vrot.lane.b32.xlu1 %v861_v13, %s808_s4  ;;  %110 = vrot.lane.b32.xlu0 %v865_v14, %s808_s4 }
  0x1d   :  { %128 = vrot.lane.b32.xlu1 %v865_v14, %s809_s7  ;;  %121 = vperm.xlu0 %794, %v747_v25  }
  0x21   :  { %139 = vperm.xlu1 %795, %v748_v28   ;;  %130 = vrot.lane.b32.xlu0 %v861_v13, %s809_s7 }
  0x25   :  { %148 = vrot.lane.b32.xlu1 %v861_v13, %s810_s14  ;;  %146 = vrot.lane.b32.xlu0 %v865_v14, %s810_s14 }
  0x29   :  { %164 = vrot.lane.b32.xlu1 %v865_v14, %s811_s17  ;;  %157 = vperm.xlu0 %794, %v749_v35  }
  0x2d   :  { %175 = vperm.xlu1 %795, %v750_v36   ;;  %166 = vrot.lane.b32.xlu0 %v861_v13, %s811_s17 }
  0x31   :  { %184 = vrot.lane.b32.xlu1 %v861_v13, %s812_s26  ;;  %182 = vrot.lane.b32.xlu0 %v865_v14, %s812_s26 }
  0x35   :  { %232 = vperm.xlu1 %795, %v754_v39   ;;  %193 = vperm.xlu0 %794, %v751_v40  }
  0x39   :  { %241 = vrot.lane.b32.xlu1 %v971_v45, %s805_s20  ;;  %239 = vrot.lane.b32.xlu0 %v975_v46, %s805_s20 }
  0x3d   :  { %256 = vrot.lane.b32.xlu1 %v975_v46, %s806_s25  ;;  %249 = vperm.xlu0 %794, %v755_v47  }
  0x41   :  { %266 = vperm.xlu1 %795, %v756_v48   ;;  %258 = vrot.lane.b32.xlu0 %v971_v45, %s806_s25  ;;  %v779_v48 = vld [vmem:[%s1307_s1 + $0xf0] sm:$0xff] }
  0x45   :  { %275 = vrot.lane.b32.xlu1 %v971_v45, %s807_s28  ;;  %273 = vrot.lane.b32.xlu0 %v975_v46, %s807_s28 }
  0x49   :  { %290 = vrot.lane.b32.xlu1 %v975_v46, %s808_s4  ;;  %283 = vperm.xlu0 %794, %v757_v49  }
  0x4d   :  { %300 = vperm.xlu1 %795, %v758_v50   ;;  %292 = vrot.lane.b32.xlu0 %v971_v45, %s808_s4 }
  0x51   :  { %309 = vrot.lane.b32.xlu1 %v971_v45, %s809_s7  ;;  %307 = vrot.lane.b32.xlu0 %v975_v46, %s809_s7 }
  0x55   :  { %324 = vrot.lane.b32.xlu1 %v975_v46, %s810_s14  ;;  %317 = vperm.xlu0 %794, %v759_v51  }
  0x59   :  { %334 = vperm.xlu1 %795, %v760_v52   ;;  %326 = vrot.lane.b32.xlu0 %v971_v45, %s810_s14 }
  0x5d   :  { %343 = vrot.lane.b32.xlu1 %v971_v45, %s811_s17  ;;  %341 = vrot.lane.b32.xlu0 %v975_v46, %s811_s17 }
  0x61   :  { %358 = vrot.lane.b32.xlu1 %v975_v46, %s812_s26  ;;  %351 = vperm.xlu0 %794, %v761_v53  }
  0x65   :  { %368 = vperm.xlu1 %795, %v762_v54   ;;  %360 = vrot.lane.b32.xlu0 %v971_v45, %s812_s26 }
  0x69   :  { %414 = vrot.lane.b32.xlu1 %v883_v21, %s805_s20  ;;  %407 = vperm.xlu0 %794, %v765_v55  }
  0x6d   :  { %424 = vperm.xlu1 %795, %v766_v56   ;;  %416 = vrot.lane.b32.xlu0 %v887_v22, %s805_s20 }
  0x71   :  { %433 = vrot.lane.b32.xlu1 %v887_v22, %s806_s25  ;;  %431 = vrot.lane.b32.xlu0 %v883_v21, %s806_s25 }
  0x75   :  { %458 = vperm.xlu1 %795, %v768_v57   ;;  %441 = vperm.xlu0 %794, %v767_v58   ;;  %v780_v57 = vld [vmem:[%s1307_s1 + $0xf8] sm:$0xff] }
  0x79   :  { %492 = vperm.xlu1 %795, %v770_v59   ;;  %475 = vperm.xlu0 %794, %v769_v60  }
  0x7d   :  { %450 = vrot.lane.b32.xlu1 %v887_v22, %s807_s28  ;;  %448 = vrot.lane.b32.xlu0 %v883_v21, %s807_s28 }
  0x81   :  { %v68_v63 = vpop.permute.xlu1 %67  ;;  %v48_v1 = vpop.permute.xlu0 %47  ;;  %465 = vrot.lane.b32.xlu1 %v883_v21, %s808_s4  ;;  %509 = vperm.xlu0 %794, %v771_v61  }
  0x82   :  { %v51_v15 = vmul.f32 %v48_v1, %v861_v13  ;;  %v50_v17 = vmul.f32 %v48_v1, %v865_v14 }
  0x85   :  { %v57_v3 = vpop.permute.xlu1 %56  ;;  %526 = vperm.xlu1 %795, %v772_v2   ;;  %467 = vrot.lane.b32.xlu0 %v887_v22, %s808_s4  ;;  %v55_v4 = vpop.permute.xlu0 %54 }
  0x86   :  { %v61_v0 = vsel %vm60_vm1, %v55_v4, %v57_v3  ;;  %v62_v5 = vsel %vm60_vm1, %v57_v3, %v55_v4 }
  0x87   :  { %v71_v11 = vmul.f32 %v68_v63, %v62_v5  ;;  %v70_v12 = vmul.f32 %v68_v63, %v61_v0  ;;  %v781_v5 = vld [vmem:[%s1307_s1 + $0x100] sm:$0xff] }
  0x89   :  { %v77_v6 = vpop.permute.xlu1 %76  ;;  %484 = vrot.lane.b32.xlu1 %v887_v22, %s809_s7  ;;  %482 = vrot.lane.b32.xlu0 %v883_v21, %s809_s7  ;;  %v75_v7 = vpop.permute.xlu0 %74  ;;  %v73_v19 = vadd.f32 %v71_v11, %v51_v15  ;;  %v72_v23 = vadd.f32 %v70_v12, %v50_v17 }
  0x8a   :  { %v79_v8 = vsel %vm78_vm2, %v75_v7, %v77_v6  ;;  %v80_v9 = vsel %vm78_vm2, %v77_v6, %v75_v7 }
  0x8d   :  { %499 = vrot.lane.b32.xlu1 %v883_v21, %s810_s14  ;;  %543 = vperm.xlu0 %794, %v773_v10   ;;  %v93_v18 = vpop.permute.xlu1 %92 }
  0x90   :  { %v86_v20 = vpop.permute.xlu0 %85 }
  0x91   :  { %v88_v24 = vmul.f32 %v86_v20, %v79_v8  ;;  %v89_v25 = vmul.f32 %v86_v20, %v80_v9  ;;  %582 = vperm.xlu1 %795, %v776_v16   ;;  %501 = vrot.lane.b32.xlu0 %v887_v22, %s810_s14  ;;  %v782_v16 = vld [vmem:[%s1307_s1 + $0x108] sm:$0xff] }
  0x93   :  { %v90_v26 = vadd.f32 %v88_v24, %v72_v23  ;;  %v91_v13 = vadd.f32 %v89_v25, %v73_v19 }
  0x94   :  { %v104_v27 = vpop.permute.xlu1 %103  ;;  %v95_v28 = vpop.permute.xlu0 %94 }
  0x95   :  { %v97_v29 = vsel %vm96_vm3, %v93_v18, %v95_v28  ;;  %v98_v14 = vsel %vm96_vm3, %v95_v28, %v93_v18  ;;  %518 = vrot.lane.b32.xlu1 %v887_v22, %s811_s17  ;;  %516 = vrot.lane.b32.xlu0 %v883_v21, %s811_s17 }
  0x96   :  { %v106_v30 = vmul.f32 %v104_v27, %v97_v29  ;;  %v107_v32 = vmul.f32 %v104_v27, %v98_v14 }
  0x98   :  { %v108_v35 = vadd.f32 %v106_v30, %v90_v26  ;;  %v109_v36 = vadd.f32 %v107_v32, %v91_v13  ;;  %v113_v37 = vpop.permute.xlu1 %112  ;;  %v111_v38 = vpop.permute.xlu0 %110  ;;  %v783_v32 = vld [vmem:[%s1307_s1 + $0x110] sm:$0xff] }
  0x99   :  { %v115_v39 = vsel %vm114_vm4, %v111_v38, %v113_v37  ;;  %v116_v40 = vsel %vm114_vm4, %v113_v37, %v111_v38  ;;  %533 = vrot.lane.b32.xlu1 %v883_v21, %s812_s26  ;;  %599 = vperm.xlu0 %794, %v777_v33  }
  0x9c   :  { %v129_v42 = vpop.permute.xlu1 %128  ;;  %v122_v43 = vpop.permute.xlu0 %121 }
  0x9d   :  { %v124_v44 = vmul.f32 %v122_v43, %v115_v39  ;;  %v125_v47 = vmul.f32 %v122_v43, %v116_v40  ;;  %616 = vperm.xlu1 %795, %v778_v41   ;;  %535 = vrot.lane.b32.xlu0 %v887_v22, %s812_s26 }
  0x9f   :  { %v126_v49 = vadd.f32 %v124_v44, %v108_v35  ;;  %v127_v50 = vadd.f32 %v125_v47, %v109_v36 }
  0xa0   :  { %v140_v51 = vpop.permute.xlu1 %139  ;;  %v131_v52 = vpop.permute.xlu0 %130 }
  0xa1   :  { %v133_v53 = vsel %vm132_vm5, %v129_v42, %v131_v52  ;;  %v134_v54 = vsel %vm132_vm5, %v131_v52, %v129_v42  ;;  %589 = vrot.lane.b32.xlu1 %v925_v31, %s805_s20  ;;  %633 = vperm.xlu0 %794, %v779_v48  }
  0xa2   :  { %v142_v55 = vmul.f32 %v140_v51, %v133_v53  ;;  %v143_v56 = vmul.f32 %v140_v51, %v134_v54 }
  0xa4   :  { %v144_v58 = vadd.f32 %v142_v55, %v126_v49  ;;  %v145_v59 = vadd.f32 %v143_v56, %v127_v50  ;;  %v149_v60 = vpop.permute.xlu1 %148  ;;  %v147_v61 = vpop.permute.xlu0 %146 }
  0xa5   :  { %v151_v63 = vsel %vm150_vm6, %v147_v61, %v149_v60  ;;  %v152_v1 = vsel %vm150_vm6, %v149_v60, %v147_v61  ;;  %650 = vperm.xlu1 %795, %v780_v57   ;;  %591 = vrot.lane.b32.xlu0 %v933_v34, %s805_s20 }
  0xa8   :  { %v165_v2 = vpop.permute.xlu1 %164  ;;  %v158_v3 = vpop.permute.xlu0 %157 }
  0xa9   :  { %v160_v4 = vmul.f32 %v158_v3, %v151_v63  ;;  %v161_v0 = vmul.f32 %v158_v3, %v152_v1  ;;  %608 = vrot.lane.b32.xlu1 %v933_v34, %s806_s25  ;;  %606 = vrot.lane.b32.xlu0 %v925_v31, %s806_s25 }
  0xab   :  { %v162_v6 = vadd.f32 %v160_v4, %v144_v58  ;;  %v163_v7 = vadd.f32 %v161_v0, %v145_v59  ;;  %v725_v59 = vld [vmem:[%s1309_s2] sm:$0xff] }
  0xac   :  { %v176_v8 = vpop.permute.xlu1 %175  ;;  %v167_v9 = vpop.permute.xlu0 %166 }
  0xad   :  { %v169_v10 = vsel %vm168_vm7, %v165_v2, %v167_v9  ;;  %v170_v11 = vsel %vm168_vm7, %v167_v9, %v165_v2  ;;  %623 = vrot.lane.b32.xlu1 %v925_v31, %s807_s28  ;;  %667 = vperm.xlu0 %794, %v781_v5  }
  0xae   :  { %v178_v12 = vmul.f32 %v176_v8, %v169_v10  ;;  %v179_v15 = vmul.f32 %v176_v8, %v170_v11 }
  0xb0   :  { %v180_v17 = vadd.f32 %v178_v12, %v162_v6  ;;  %v181_v18 = vadd.f32 %v179_v15, %v163_v7  ;;  %v185_v19 = vpop.permute.xlu1 %184  ;;  %v183_v20 = vpop.permute.xlu0 %182 }
  0xb1   :  { %v187_v23 = vsel %vm186_vm8, %v183_v20, %v185_v19  ;;  %v188_v24 = vsel %vm186_vm8, %v185_v19, %v183_v20  ;;  %684 = vperm.xlu1 %795, %v782_v16   ;;  %625 = vrot.lane.b32.xlu0 %v933_v34, %s807_s28 }
  0xb4   :  { %v233_v25 = vpop.permute.xlu1 %232  ;;  %v194_v26 = vpop.permute.xlu0 %193 }
  0xb5   :  { %v196_v13 = vmul.f32 %v194_v26, %v187_v23  ;;  %v197_v27 = vmul.f32 %v194_v26, %v188_v24  ;;  %642 = vrot.lane.b32.xlu1 %v933_v34, %s808_s4  ;;  %640 = vrot.lane.b32.xlu0 %v925_v31, %s808_s4  ;;  %v235_v28 = vmul.f32 %v233_v25, %v975_v46 }
  0xb6   :  { %v236_v29 = vmul.f32 %v233_v25, %v971_v45  ;;  %v784_v45 = vld [vmem:[%s1307_s1 + $0x118] sm:$0xff] }
  0xb7   :  { %v198_v14 = vadd.f32 %v196_v13, %v180_v17  ;;  %v199_v30 = vadd.f32 %v197_v27, %v181_v18 }
  0xb8   :  { %v242_v33 = vpop.permute.xlu1 %241  ;;  %v240_v35 = vpop.permute.xlu0 %239 }
  0xb9   :  { %v243_v36 = vsel %vm60_vm1, %v240_v35, %v242_v33  ;;  %v244_v37 = vsel %vm60_vm1, %v242_v33, %v240_v35  ;;  %657 = vrot.lane.b32.xlu1 %v925_v31, %s809_s7  ;;  %v238_v46 = vadd.f32 %v236_v29, %v199_v30  ;;  %v237_v38 = vadd.f32 %v235_v28, %v198_v14 }
  0xba   :  { %701 = vperm.xlu0 %794, %v783_v32  }
  0xbc   :  { %v257_v39 = vpop.permute.xlu1 %256  ;;  %v250_v40 = vpop.permute.xlu0 %249 }
  0xbd   :  { %v252_v41 = vmul.f32 %v250_v40, %v243_v36  ;;  %v253_v42 = vmul.f32 %v250_v40, %v244_v37  ;;  %718 = vperm.xlu1 %795, %v784_v45  }
  0xbe   :  { %659 = vrot.lane.b32.xlu0 %v933_v34, %s809_s7 }
  0xbf   :  { %v254_v43 = vadd.f32 %v252_v41, %v237_v38  ;;  %v255_v44 = vadd.f32 %v253_v42, %v238_v46 }
  0xc0   :  { %v267_v47 = vpop.permute.xlu1 %266  ;;  %v259_v48 = vpop.permute.xlu0 %258 }
  0xc1   :  { %v260_v49 = vsel %vm78_vm2, %v257_v39, %v259_v48  ;;  %v261_v50 = vsel %vm78_vm2, %v259_v48, %v257_v39  ;;  %676 = vrot.lane.b32.xlu1 %v933_v34, %s810_s14 }
  0xc2   :  { %v269_v51 = vmul.f32 %v267_v47, %v260_v49  ;;  %v270_v52 = vmul.f32 %v267_v47, %v261_v50  ;;  %674 = vrot.lane.b32.xlu0 %v925_v31, %s810_s14 }
  0xc4   :  { %v271_v53 = vadd.f32 %v269_v51, %v254_v43  ;;  %v272_v54 = vadd.f32 %v270_v52, %v255_v44  ;;  %v276_v55 = vpop.permute.xlu1 %275  ;;  %v274_v56 = vpop.permute.xlu0 %273 }
  0xc5   :  { %v277_v57 = vsel %vm96_vm3, %v274_v56, %v276_v55  ;;  %v278_v58 = vsel %vm96_vm3, %v276_v55, %v274_v56  ;;  %693 = vrot.lane.b32.xlu1 %v933_v34, %s811_s17 }
  0xc6   :  { %691 = vrot.lane.b32.xlu0 %v925_v31, %s811_s17 }
  0xc8   :  { %v291_v60 = vpop.permute.xlu1 %290  ;;  %v284_v61 = vpop.permute.xlu0 %283 }
  0xc9   :  { %v286_v63 = vmul.f32 %v284_v61, %v277_v57  ;;  %v287_v1 = vmul.f32 %v284_v61, %v278_v58  ;;  %708 = vrot.lane.b32.xlu1 %v925_v31, %s812_s26 }
  0xca   :  { %728 = vperm.xlu0 %794, %v725_v59  }
  0xcb   :  { %v288_v2 = vadd.f32 %v286_v63, %v271_v53  ;;  %v289_v3 = vadd.f32 %v287_v1, %v272_v54 }
  0xcc   :  { %v301_v4 = vpop.permute.xlu1 %300  ;;  %v293_v0 = vpop.permute.xlu0 %292 }
  0xcd   :  { %v294_v5 = vsel %vm114_vm4, %v291_v60, %v293_v0  ;;  %v295_v6 = vsel %vm114_vm4, %v293_v0, %v291_v60 }
  0xce   :  { %v303_v7 = vmul.f32 %v301_v4, %v294_v5  ;;  %v304_v8 = vmul.f32 %v301_v4, %v295_v6  ;;  %710 = vrot.lane.b32.xlu0 %v933_v34, %s812_s26 }
  0xd0   :  { %v305_v9 = vadd.f32 %v303_v7, %v288_v2  ;;  %v306_v10 = vadd.f32 %v304_v8, %v289_v3  ;;  %v310_v11 = vpop.permute.xlu1 %309  ;;  %v308_v12 = vpop.permute.xlu0 %307 }
  0xd1   :  { %v311_v15 = vsel %vm132_vm5, %v308_v12, %v310_v11  ;;  %v312_v16 = vsel %vm132_vm5, %v310_v11, %v308_v12 }
  0xd4   :  { %v325_v17 = vpop.permute.xlu1 %324  ;;  %v318_v18 = vpop.permute.xlu0 %317 }
  0xd5   :  { %v320_v19 = vmul.f32 %v318_v18, %v311_v15  ;;  %v321_v20 = vmul.f32 %v318_v18, %v312_v16 }
  0xd7   :  { %v322_v23 = vadd.f32 %v320_v19, %v305_v9  ;;  %v323_v24 = vadd.f32 %v321_v20, %v306_v10 }
  0xd8   :  { %v335_v25 = vpop.permute.xlu1 %334  ;;  %v327_v26 = vpop.permute.xlu0 %326 }
  0xd9   :  { %v328_v13 = vsel %vm150_vm6, %v325_v17, %v327_v26  ;;  %v329_v27 = vsel %vm150_vm6, %v327_v26, %v325_v17 }
  0xda   :  { %v337_v28 = vmul.f32 %v335_v25, %v328_v13  ;;  %v338_v29 = vmul.f32 %v335_v25, %v329_v27 }
  0xdc   :  { %v339_v14 = vadd.f32 %v337_v28, %v322_v23  ;;  %v340_v30 = vadd.f32 %v338_v29, %v323_v24  ;;  %v344_v32 = vpop.permute.xlu1 %343  ;;  %v342_v33 = vpop.permute.xlu0 %341 }
  0xdd   :  { %v345_v35 = vsel %vm168_vm7, %v342_v33, %v344_v32  ;;  %v346_v36 = vsel %vm168_vm7, %v344_v32, %v342_v33 }
  0xe0   :  { %v359_v37 = vpop.permute.xlu1 %358  ;;  %v352_v46 = vpop.permute.xlu0 %351 }
  0xe1   :  { %v354_v38 = vmul.f32 %v352_v46, %v345_v35  ;;  %v355_v45 = vmul.f32 %v352_v46, %v346_v36 }
  0xe3   :  { %v356_v39 = vadd.f32 %v354_v38, %v339_v14  ;;  %v357_v40 = vadd.f32 %v355_v45, %v340_v30 }
  0xe4   :  { %v369_v41 = vpop.permute.xlu1 %368  ;;  %v361_v42 = vpop.permute.xlu0 %360 }
  0xe5   :  { %v362_v43 = vsel %vm186_vm8, %v359_v37, %v361_v42  ;;  %v363_v44 = vsel %vm186_vm8, %v361_v42, %v359_v37 }
  0xe6   :  { %v371_v47 = vmul.f32 %v369_v41, %v362_v43  ;;  %v372_v48 = vmul.f32 %v369_v41, %v363_v44 }
  0xe8   :  { %v373_v49 = vadd.f32 %v371_v47, %v356_v39  ;;  %v374_v50 = vadd.f32 %v372_v48, %v357_v40  ;;  %v415_v51 = vpop.permute.xlu1 %414  ;;  %v408_v52 = vpop.permute.xlu0 %407 }
  0xe9   :  { %v410_v53 = vmul.f32 %v408_v52, %v883_v21  ;;  %v411_v54 = vmul.f32 %v408_v52, %v887_v22 }
  0xeb   :  { %v412_v55 = vadd.f32 %v410_v53, %v373_v49  ;;  %v413_v56 = vadd.f32 %v411_v54, %v374_v50 }
  0xec   :  { %v425_v57 = vpop.permute.xlu1 %424  ;;  %v417_v58 = vpop.permute.xlu0 %416 }
  0xed   :  { %v418_v59 = vsel %vm60_vm1, %v415_v51, %v417_v58  ;;  %v419_v60 = vsel %vm60_vm1, %v417_v58, %v415_v51 }
  0xee   :  { %v427_v61 = vmul.f32 %v425_v57, %v418_v59  ;;  %v428_v63 = vmul.f32 %v425_v57, %v419_v60 }
  0xf0   :  { %v429_v1 = vadd.f32 %v427_v61, %v412_v55  ;;  %v430_v2 = vadd.f32 %v428_v63, %v413_v56  ;;  %v434_v3 = vpop.permute.xlu1 %433  ;;  %v432_v4 = vpop.permute.xlu0 %431 }
  0xf1   :  { %v435_v21 = vsel %vm78_vm2, %v432_v4, %v434_v3  ;;  %v436_v22 = vsel %vm78_vm2, %v434_v3, %v432_v4 }
  0xf4   :  { %v459_v0 = vpop.permute.xlu1 %458  ;;  %v442_v5 = vpop.permute.xlu0 %441 }
  0xf5   :  { %v444_v6 = vmul.f32 %v442_v5, %v435_v21  ;;  %v445_v7 = vmul.f32 %v442_v5, %v436_v22 }
  0xf7   :  { %v446_v8 = vadd.f32 %v444_v6, %v429_v1  ;;  %v447_v9 = vadd.f32 %v445_v7, %v430_v2 }
  0xf8   :  { %v493_v10 = vpop.permute.xlu1 %492  ;;  %v476_v11 = vpop.permute.xlu0 %475 }
  0xfc   :  { %v451_v12 = vpop.permute.xlu1 %450  ;;  %v449_v15 = vpop.permute.xlu0 %448 }
  0xfd   :  { %v452_v16 = vsel %vm96_vm3, %v449_v15, %v451_v12  ;;  %v453_v17 = vsel %vm96_vm3, %v451_v12, %v449_v15 }
  0xfe   :  { %v461_v18 = vmul.f32 %v459_v0, %v452_v16  ;;  %v462_v19 = vmul.f32 %v459_v0, %v453_v17 }
 0x100   :  { %v463_v20 = vadd.f32 %v461_v18, %v446_v8  ;;  %v464_v23 = vadd.f32 %v462_v19, %v447_v9  ;;  %v466_v24 = vpop.permute.xlu1 %465  ;;  %v510_v25 = vpop.permute.xlu0 %509 }
 0x104   :  { %v527_v26 = vpop.permute.xlu1 %526  ;;  %v468_v13 = vpop.permute.xlu0 %467 }
 0x105   :  { %v469_v27 = vsel %vm114_vm4, %v466_v24, %v468_v13  ;;  %v470_v28 = vsel %vm114_vm4, %v468_v13, %v466_v24 }
 0x106   :  { %v478_v29 = vmul.f32 %v476_v11, %v469_v27  ;;  %v479_v14 = vmul.f32 %v476_v11, %v470_v28 }
 0x108   :  { %v480_v30 = vadd.f32 %v478_v29, %v463_v20  ;;  %v481_v32 = vadd.f32 %v479_v14, %v464_v23  ;;  %v485_v33 = vpop.permute.xlu1 %484  ;;  %v483_v35 = vpop.permute.xlu0 %482 }
 0x109   :  { %v486_v36 = vsel %vm132_vm5, %v483_v35, %v485_v33  ;;  %v487_v37 = vsel %vm132_vm5, %v485_v33, %v483_v35 }
 0x10a   :  { %v495_v46 = vmul.f32 %v493_v10, %v486_v36  ;;  %v496_v38 = vmul.f32 %v493_v10, %v487_v37 }
 0x10c   :  { %v497_v45 = vadd.f32 %v495_v46, %v480_v30  ;;  %v498_v39 = vadd.f32 %v496_v38, %v481_v32  ;;  %v500_v40 = vpop.permute.xlu1 %499  ;;  %v544_v41 = vpop.permute.xlu0 %543 }
 0x110   :  { %v583_v42 = vpop.permute.xlu1 %582  ;;  %v502_v43 = vpop.permute.xlu0 %501 }
 0x111   :  { %v503_v44 = vsel %vm150_vm6, %v500_v40, %v502_v43  ;;  %v504_v47 = vsel %vm150_vm6, %v502_v43, %v500_v40  ;;  %v585_v7 = vmul.f32 %v583_v42, %v925_v31  ;;  %v586_v8 = vmul.f32 %v583_v42, %v933_v34 }
 0x112   :  { %v512_v48 = vmul.f32 %v510_v25, %v503_v44  ;;  %v513_v49 = vmul.f32 %v510_v25, %v504_v47 }
 0x114   :  { %v514_v50 = vadd.f32 %v512_v48, %v497_v45  ;;  %v515_v51 = vadd.f32 %v513_v49, %v498_v39  ;;  %v519_v52 = vpop.permute.xlu1 %518  ;;  %v517_v53 = vpop.permute.xlu0 %516 }
 0x115   :  { %v520_v54 = vsel %vm168_vm7, %v517_v53, %v519_v52  ;;  %v521_v55 = vsel %vm168_vm7, %v519_v52, %v517_v53 }
 0x116   :  { %v529_v56 = vmul.f32 %v527_v26, %v520_v54  ;;  %v530_v57 = vmul.f32 %v527_v26, %v521_v55 }
 0x118   :  { %v531_v58 = vadd.f32 %v529_v56, %v514_v50  ;;  %v532_v59 = vadd.f32 %v530_v57, %v515_v51  ;;  %v534_v60 = vpop.permute.xlu1 %533  ;;  %v600_v61 = vpop.permute.xlu0 %599 }
 0x11c   :  { %v617_v63 = vpop.permute.xlu1 %616  ;;  %v536_v1 = vpop.permute.xlu0 %535 }
 0x11d   :  { %v537_v2 = vsel %vm186_vm8, %v534_v60, %v536_v1  ;;  %v538_v3 = vsel %vm186_vm8, %v536_v1, %v534_v60 }
 0x11e   :  { %v546_v4 = vmul.f32 %v544_v41, %v537_v2  ;;  %v547_v21 = vmul.f32 %v544_v41, %v538_v3 }
 0x120   :  { %v548_v22 = vadd.f32 %v546_v4, %v531_v58  ;;  %v549_v0 = vadd.f32 %v547_v21, %v532_v59  ;;  %v590_v5 = vpop.permute.xlu1 %589  ;;  %v634_v6 = vpop.permute.xlu0 %633 }
 0x122   :  { %v588_v15 = vadd.f32 %v586_v8, %v549_v0  ;;  %v587_v16 = vadd.f32 %v585_v7, %v548_v22 }
 0x124   :  { %v651_v9 = vpop.permute.xlu1 %650  ;;  %v592_v10 = vpop.permute.xlu0 %591 }
 0x125   :  { %v593_v11 = vsel %vm60_vm1, %v590_v5, %v592_v10  ;;  %v594_v12 = vsel %vm60_vm1, %v592_v10, %v590_v5 }
 0x126   :  { %v602_v17 = vmul.f32 %v600_v61, %v593_v11  ;;  %v603_v18 = vmul.f32 %v600_v61, %v594_v12 }
 0x128   :  { %v604_v19 = vadd.f32 %v602_v17, %v587_v16  ;;  %v605_v20 = vadd.f32 %v603_v18, %v588_v15  ;;  %v609_v23 = vpop.permute.xlu1 %608  ;;  %v607_v24 = vpop.permute.xlu0 %606 }
 0x129   :  { %v610_v31 = vsel %vm78_vm2, %v607_v24, %v609_v23  ;;  %v611_v34 = vsel %vm78_vm2, %v609_v23, %v607_v24 }
 0x12a   :  { %v619_v25 = vmul.f32 %v617_v63, %v610_v31  ;;  %v620_v26 = vmul.f32 %v617_v63, %v611_v34 }
 0x12c   :  { %v621_v13 = vadd.f32 %v619_v25, %v604_v19  ;;  %v622_v27 = vadd.f32 %v620_v26, %v605_v20  ;;  %v624_v28 = vpop.permute.xlu1 %623  ;;  %v668_v29 = vpop.permute.xlu0 %667 }
 0x130   :  { %v685_v14 = vpop.permute.xlu1 %684  ;;  %v626_v30 = vpop.permute.xlu0 %625 }
 0x131   :  { %v627_v32 = vsel %vm96_vm3, %v624_v28, %v626_v30  ;;  %v628_v33 = vsel %vm96_vm3, %v626_v30, %v624_v28 }
 0x132   :  { %v636_v35 = vmul.f32 %v634_v6, %v627_v32  ;;  %v637_v36 = vmul.f32 %v634_v6, %v628_v33 }
 0x134   :  { %v638_v37 = vadd.f32 %v636_v35, %v621_v13  ;;  %v639_v46 = vadd.f32 %v637_v36, %v622_v27  ;;  %v643_v38 = vpop.permute.xlu1 %642  ;;  %v641_v45 = vpop.permute.xlu0 %640 }
 0x135   :  { %v644_v39 = vsel %vm114_vm4, %v641_v45, %v643_v38  ;;  %v645_v40 = vsel %vm114_vm4, %v643_v38, %v641_v45 }
 0x136   :  { %v653_v41 = vmul.f32 %v651_v9, %v644_v39  ;;  %v654_v42 = vmul.f32 %v651_v9, %v645_v40 }
 0x138   :  { %v655_v43 = vadd.f32 %v653_v41, %v638_v37  ;;  %v656_v44 = vadd.f32 %v654_v42, %v639_v46  ;;  %v658_v47 = vpop.permute.xlu1 %657 }
 0x139   :  { %v702_v48 = vpop.permute.xlu0 %701 }
 0x13c   :  { %v719_v49 = vpop.permute.xlu1 %718 }
 0x13d   :  { %v660_v50 = vpop.permute.xlu0 %659 }
 0x13e   :  { %v661_v51 = vsel %vm132_vm5, %v658_v47, %v660_v50  ;;  %v662_v52 = vsel %vm132_vm5, %v660_v50, %v658_v47 }
 0x13f   :  { %v670_v53 = vmul.f32 %v668_v29, %v661_v51  ;;  %v671_v54 = vmul.f32 %v668_v29, %v662_v52 }
 0x140   :  { %v677_v55 = vpop.permute.xlu1 %676 }
 0x141   :  { %v672_v56 = vadd.f32 %v670_v53, %v655_v43  ;;  %v673_v57 = vadd.f32 %v671_v54, %v656_v44  ;;  %v675_v58 = vpop.permute.xlu0 %674 }
 0x142   :  { %v678_v59 = vsel %vm150_vm6, %v675_v58, %v677_v55  ;;  %v679_v60 = vsel %vm150_vm6, %v677_v55, %v675_v58 }
 0x143   :  { %v687_v61 = vmul.f32 %v685_v14, %v678_v59  ;;  %v688_v63 = vmul.f32 %v685_v14, %v679_v60 }
 0x144   :  { %v694_v1 = vpop.permute.xlu1 %693 }
 0x145   :  { %v689_v2 = vadd.f32 %v687_v61, %v672_v56  ;;  %v690_v3 = vadd.f32 %v688_v63, %v673_v57  ;;  %v692_v4 = vpop.permute.xlu0 %691 }
 0x146   :  { %v695_v21 = vsel %vm168_vm7, %v692_v4, %v694_v1  ;;  %v696_v22 = vsel %vm168_vm7, %v694_v1, %v692_v4 }
 0x147   :  { %v704_v0 = vmul.f32 %v702_v48, %v695_v21  ;;  %v705_v5 = vmul.f32 %v702_v48, %v696_v22 }
 0x148   :  { %v709_v9 = vpop.permute.xlu1 %708 }
 0x149   :  { %v706_v6 = vadd.f32 %v704_v0, %v689_v2  ;;  %v707_v7 = vadd.f32 %v705_v5, %v690_v3  ;;  %v729_v8 = vpop.permute.xlu0 %728 }
 0x14d   :  { %v711_v10 = vpop.permute.xlu0 %710 }
 0x14e   :  { %v712_v11 = vsel %vm186_vm8, %v709_v9, %v711_v10  ;;  %v713_v12 = vsel %vm186_vm8, %v711_v10, %v709_v9 }
 0x14f   :  { %v721_v15 = vmul.f32 %v719_v49, %v712_v11  ;;  %v722_v16 = vmul.f32 %v719_v49, %v713_v12 }
 0x151   :  { %v723_v17 = vadd.f32 %v721_v15, %v706_v6  ;;  %v724_v18 = vadd.f32 %v722_v16, %v707_v7 }
 0x153   :  { %v731_v19 = vadd.f32 %v729_v8, %v723_v17  ;;  %v732_v20 = vadd.f32 %v729_v8, %v724_v18 }
 0x155   :  { %796 = vtanh.f32 %v731_v19 }
 0x156   :  { %798 = vtanh.f32 %v732_v20 }
 0x15f   :  { %v797_v23 = vpop.eup %796 }
 0x160   :  { %v799_v24 = vpop.eup %798  ;;  %800 = vtanh.f32 %v797_v23 }
 0x161   :  { %802 = vtanh.f32 %v799_v24 }
 0x16a   :  { %v801_v31 = vpop.eup %800 }
 0x16b   :  { %v803_v34 = vpop.eup %802  ;;  %737 = vst [vmem:[%s1310_s3] sm:$0xff] %v801_v31 }
 0x16c   :  { %738 = vst [vmem:[%s1310_s3 + $0x8] sm:$0xff] %v803_v34 }

</bundles_post_ra>
